<compile_context>
chip_gen: v7x
topology: tpu7x:2x2x1
jax: 0.10.0
libtpu: 0.0.40
codegen_flags: <defaults>
</compile_context>

<pallas_src>
import functools

import jax
import jax.numpy as jnp
from jax.experimental import pallas as pl
from jax.experimental.pallas import tpu as pltpu


def _gbn_kernel(x_ref, gamma_ref, beta_ref, o_ref, *, eps, inv_n):
    # x_ref: (tc, chunk, TD) — tc independent ghost batches x one feature tile.
    x = x_ref[...].astype(jnp.float32)

    # Two-pass per-chunk statistics over the virtual-batch axis (axis=1).
    mean = jnp.sum(x, axis=1, keepdims=True) * inv_n        # (tc, 1, TD)
    centered = x - mean                                      # (tc, chunk, TD)
    var = jnp.sum(centered * centered, axis=1, keepdims=True) * inv_n
    inv_std = jax.lax.rsqrt(var + eps)                       # (tc, 1, TD)

    gamma = gamma_ref[...].astype(jnp.float32)               # (1, TD)
    beta = beta_ref[...].astype(jnp.float32)                 # (1, TD)

    # Fused affine on the already-centered values.
    scale = inv_std * gamma                                  # (tc, 1, TD)
    o_ref[...] = (centered * scale + beta).astype(o_ref.dtype)


def ghost_batch_norm(x, gamma, beta, virtual_batch_size, eps=1e-5):
    B, D = x.shape
    n_chunks = B // virtual_batch_size
    if n_chunks == 0:
        n_chunks = 1
    # torch.chunk(n_chunks) yields equal chunks when B % n_chunks == 0 (usual case).
    # TODO(synk): ragged last chunk (B % n_chunks != 0) not handled in-kernel.
    assert B % n_chunks == 0, "B must be divisible by the number of ghost chunks"
    chunk = B // n_chunks

    # ---- per-generation block sizing (memory-bound kernel) -------------------
    try:
        vmem_cap = int(pltpu.get_tpu_info().vmem_capacity_bytes)
    except Exception:  # pragma: no cover - conservative fallback (v7x-safe)
        vmem_cap = 64 << 20
    # Budget for ONE input block in f32-equivalent bytes.  //24 leaves room for
    # double-buffered in+out blocks plus ~3 f32 temporaries under the scoped
    # VMEM limit; >=1 MiB blocks already reach ~85% of HBM roofline, so we do
    # not chase larger blocks or deeper buffering.
    block_budget = max(1 << 20, min(vmem_cap // 24, 6 << 20))
    vmem_limit = int(min(vmem_cap // 2, 64 << 20))

    eb = max(x.dtype.itemsize, 4)  # f32-equivalent bytes/element (f32 temps dominate)

    # ---- feature-axis (lane) tiling: only if one ghost chunk overflows -------
    if chunk * D * eb <= block_budget:
        td = D                                   # full feature dim, no tiling
    else:
        td = max(128, (block_budget // (chunk * eb)) // 128 * 128)
        td = min(td, D)
        # td is a multiple of 128 (< D): satisfies the lane-tiling constraint.
        # A partial trailing D-block is padded on read / masked on write; the
        # padded columns compute garbage but never reach HBM.
    grid_d = pl.cdiv(D, td)

    # ---- ghost-chunk (grid axis 0) tiling -------------------------------------
    per_chunk_bytes = chunk * td * eb
    tc_cap = max(1, block_budget // per_chunk_bytes)
    tc = min(tc_cap, n_chunks)
    if n_chunks >= 2 and grid_d == 1:
        # Keep >= 2 grid steps so v7x's two TensorCores both get work
        # (negligible extra per-step overhead on single-TC v5e/v6e).
        tc = min(tc, pl.cdiv(n_chunks, 2))
    grid_c = pl.cdiv(n_chunks, tc)
    # Padded trailing chunk-blocks (n_chunks % tc != 0) are safe: per-chunk
    # stats, masked writes.

    x3 = x.reshape(n_chunks, chunk, D)
    gamma2 = gamma.reshape(1, D)
    beta2 = beta.reshape(1, D)

    out = pl.pallas_call(
        functools.partial(_gbn_kernel, eps=float(eps), inv_n=1.0 / float(chunk)),
        out_shape=jax.ShapeDtypeStruct((n_chunks, chunk, D), x.dtype),
        grid_spec=pltpu.PrefetchScalarGridSpec(
            num_scalar_prefetch=0,
            grid=(grid_c, grid_d),
            in_specs=[
                pl.BlockSpec((tc, chunk, td), lambda i, j: (i, 0, j)),
                pl.BlockSpec((1, td), lambda i, j: (0, j)),
                pl.BlockSpec((1, td), lambda i, j: (0, j)),
            ],
            out_specs=pl.BlockSpec((tc, chunk, td), lambda i, j: (i, 0, j)),
        ),
        compiler_params=pltpu.CompilerParams(
            dimension_semantics=("parallel", "parallel"),
            vmem_limit_bytes=vmem_limit,
        ),
    )(x3, gamma2, beta2)

    return out.reshape(B, D)


def ghost_batch_norm_ref(x, gamma, beta, virtual_batch_size, eps=1e-5):
    """Pure-JAX reference for sanity checking."""
    B, D = x.shape
    n_chunks = max(B // virtual_batch_size, 1)
    chunk = B // n_chunks
    x3 = x.reshape(n_chunks, chunk, D).astype(jnp.float32)
    mean = jnp.mean(x3, axis=1, keepdims=True)
    var = jnp.mean((x3 - mean) ** 2, axis=1, keepdims=True)
    y = (x3 - mean) * jax.lax.rsqrt(var + eps) * gamma.reshape(1, 1, D) + beta.reshape(1, 1, D)
    return y.reshape(B, D).astype(x.dtype)


if __name__ == "__main__":
    # Small shapes consistent with the module: batch=8, input_dims=32,
    # virtual_batch_size=4 -> 2 ghost batches of 4.
    B, D, V = 8, 32, 4

    key = jax.random.PRNGKey(0)
    x = jax.random.normal(key, (B, D), dtype=jnp.float32)

    # BatchNorm1d affine params at their deterministic __init__ values.
    gamma = jnp.ones((D,), dtype=jnp.float32)
    beta = jnp.zeros((D,), dtype=jnp.float32)

    # TODO(synk): running_mean/running_var momentum update (stateful BN buffers)
    # is not produced by this forward-only kernel.
    out = ghost_batch_norm(x, gamma, beta, virtual_batch_size=V)
    out = jax.block_until_ready(out)

    ref = ghost_batch_norm_ref(x, gamma, beta, virtual_batch_size=V)
    assert out.shape == (B, D)
    assert jnp.max(jnp.abs(out - ref)) < 1e-4

    print("KERNEL_OK")
</pallas_src>

<mosaic_0001>
module attributes {stable_mosaic.version = 11 : i64} {
  func.func @_gbn_kernel(%arg0: i32, %arg1: i32, %arg2: memref<1x4x32xf32, #tpu.memory_space<vmem>>, %arg3: memref<1x32xf32, #tpu.memory_space<vmem>>, %arg4: memref<1x32xf32, #tpu.memory_space<vmem>>, %arg5: memref<1x4x32xf32, #tpu.memory_space<vmem>>) attributes {dimension_semantics = [#tpu.dimension_semantics<parallel>, #tpu.dimension_semantics<parallel>], iteration_bounds = array<i64: 2, 1>, scalar_prefetch = 0 : i64, scratch_operands = 0 : i64, tpu.core_type = #tpu.core_type<tc>, window_params = [{transform_indices = @transform_0, window_bounds = array<i64: 1, 4, 32>}, {transform_indices = @transform_1, window_bounds = array<i64: 1, 32>}, {transform_indices = @transform_2, window_bounds = array<i64: 1, 32>}, {transform_indices = @transform_3, window_bounds = array<i64: 1, 4, 32>}]} {
    %c0 = arith.constant 0 : index
    %c0_0 = arith.constant 0 : index
    %c0_1 = arith.constant 0 : index
    %0 = vector.load %arg2[%c0, %c0_0, %c0_1] : memref<1x4x32xf32, #tpu.memory_space<vmem>>, vector<1x4x32xf32>
    %cst = arith.constant dense<0.000000e+00> : vector<1x32xf32>
    %1 = vector.multi_reduction <add>, %0, %cst [1] : vector<1x4x32xf32> to vector<1x32xf32>
    %2 = vector.shape_cast %1 : vector<1x32xf32> to vector<1x1x32xf32>
    %cst_2 = arith.constant 2.500000e-01 : f32
    %3 = vector.broadcast %cst_2 : f32 to vector<1x1x32xf32>
    %4 = arith.mulf %2, %3 : vector<1x1x32xf32>
    %5 = vector.broadcast %4 : vector<1x1x32xf32> to vector<1x4x32xf32>
    %6 = arith.subf %0, %5 : vector<1x4x32xf32>
    %7 = arith.mulf %6, %6 : vector<1x4x32xf32>
    %cst_3 = arith.constant dense<0.000000e+00> : vector<1x32xf32>
    %8 = vector.multi_reduction <add>, %7, %cst_3 [1] : vector<1x4x32xf32> to vector<1x32xf32>
    %9 = vector.shape_cast %8 : vector<1x32xf32> to vector<1x1x32xf32>
    %cst_4 = arith.constant 2.500000e-01 : f32
    %10 = vector.broadcast %cst_4 : f32 to vector<1x1x32xf32>
    %11 = arith.mulf %9, %10 : vector<1x1x32xf32>
    %cst_5 = arith.constant 9.99999974E-6 : f32
    %12 = vector.broadcast %cst_5 : f32 to vector<1x1x32xf32>
    %13 = arith.addf %11, %12 : vector<1x1x32xf32>
    %14 = math.rsqrt %13 : vector<1x1x32xf32>
    %c0_6 = arith.constant 0 : index
    %c0_7 = arith.constant 0 : index
    %15 = vector.load %arg3[%c0_6, %c0_7] : memref<1x32xf32, #tpu.memory_space<vmem>>, vector<1x32xf32>
    %c0_8 = arith.constant 0 : index
    %c0_9 = arith.constant 0 : index
    %16 = vector.load %arg4[%c0_8, %c0_9] : memref<1x32xf32, #tpu.memory_space<vmem>>, vector<1x32xf32>
    %17 = vector.shape_cast %15 : vector<1x32xf32> to vector<1x1x32xf32>
    %18 = arith.mulf %14, %17 : vector<1x1x32xf32>
    %19 = vector.broadcast %18 : vector<1x1x32xf32> to vector<1x4x32xf32>
    %20 = arith.mulf %6, %19 : vector<1x4x32xf32>
    %21 = vector.shape_cast %16 : vector<1x32xf32> to vector<1x1x32xf32>
    %22 = vector.broadcast %21 : vector<1x1x32xf32> to vector<1x4x32xf32>
    %23 = arith.addf %20, %22 : vector<1x4x32xf32>
    %c0_10 = arith.constant 0 : index
    %c0_11 = arith.constant 0 : index
    %c0_12 = arith.constant 0 : index
    %24 = vector.load %arg5[%c0_10, %c0_11, %c0_12] : memref<1x4x32xf32, #tpu.memory_space<vmem>>, vector<1x4x32xf32>
    tpu.vector_store %arg5[%c0_10, %c0_11, %c0_12], %23 {strides = array<i32>} : memref<1x4x32xf32, #tpu.memory_space<vmem>>, vector<1x4x32xf32>,
    return
  }
  func.func @transform_0(%arg0: i32, %arg1: i32) -> (i32, i32, i32) {
    %c0_i32 = arith.constant 0 : i32
    %c0_i32_0 = arith.constant 0 : i32
    return %arg0, %c0_i32, %arg1 : i32, i32, i32
  }
  func.func @transform_1(%arg0: i32, %arg1: i32) -> (i32, i32) {
    %c0_i32 = arith.constant 0 : i32
    %c0_i32_0 = arith.constant 0 : i32
    return %c0_i32, %arg1 : i32, i32
  }
  func.func @transform_2(%arg0: i32, %arg1: i32) -> (i32, i32) {
    %c0_i32 = arith.constant 0 : i32
    %c0_i32_0 = arith.constant 0 : i32
    return %c0_i32, %arg1 : i32, i32
  }
  func.func @transform_3(%arg0: i32, %arg1: i32) -> (i32, i32, i32) {
    %c0_i32 = arith.constant 0 : i32
    %c0_i32_0 = arith.constant 0 : i32
    return %arg0, %c0_i32, %arg1 : i32, i32, i32
  }
}

</mosaic_0001>

<bundles_post_ra>
// kernel: tpu_custom_call.1
= control target key start
LH: loop header
LB: loop body
LE: loop exit
PB: predicated region body
PF: predicated region fallthrough
CT: control target
= control target key end

     0   :  { %8 = vsyncpa [#allocation3], 0  ;;  %s789_s0 = inlined_call_operand.hbm [shape: f32[2,4,32], index: 0, kind: input, shape index: {}]   ;;  %s790_s1 = inlined_call_operand.vmem [shape: f32[1,32], index: 1, kind: input, shape index: {}]   ;;  %s791_s2 = inlined_call_operand.vmem [shape: f32[1,32], index: 2, kind: input, shape index: {}]   ;;  %s792_s3 = inlined_call_operand.hbm [shape: f32[2,4,32], index: 3, kind: output, shape index: {}]  }
   0x1   :  { %10 = vsyncpa [#allocation3 + $0x1], 0 }
   0x2   :  { %11 = vsyncpa [#allocation4], 0 }
   0x3   :  { %13 = vsyncpa [#allocation4 + $0x1], 0  ;;  %s604_s12 = smov 0   ;;  %s606_s13 = smov 0  }
   0x4   :  { %s608_s14 = smov 0   ;;  %s610_s15 = smov 0  }
   0x5   :  { %s612_s16 = smov 0   ;;  %s614_s17 = smov 0  }
   0x6 LB: > { %s388_s18 = sadd.s32 4294967295, %s580_s17   ;;  %s389_s19 = sadd.s32 4294967294, %s580_s17   ;;  %s580_s17 = sphi %s614_s17, %s19_s17   ;;  %s576_s16 = sphi %s612_s16, %s808_s16   ;;  %s572_s15 = sphi %s610_s15, %s807_s15   ;;  %s568_s14 = sphi %s608_s14, %s806_s14   ;;  %s564_s13 = sphi %s606_s13, %s805_s13   ;;  %s560_s12 = sphi %s604_s12, %s804_s12  }
   0x7   : > { %s31_s20 = sadd.s32 1, %s576_s16  ;;  %s40_s21 = sadd.s32 1, %s568_s14 }
   0x8   : > { %p33_p0 = scmp.ge.s32.totalorder %s31_s20, 2  ;;  %p47_p1 = scmp.ne.s32.totalorder %s568_s14, %s564_s13 }
   0x9   : > { %p48_p2 = scmp.eq.s32.totalorder %s580_s17, 0  ;;  %p53_p3 = scmp.ne.s32.totalorder %s564_s13, %s560_s12 }
   0xa   : > { %s810_s20 = smov (%p33_p0, %s31_s20), 0  ;;  %p54_p5 = scmp.eq.s32.totalorder %s388_s18, 0 }
   0xb   : > { %p645_p4 = por %p48_p2, %p47_p1  ;;  %s35_s23 = ssub.s32 %s576_s16, %s810_s20 }
   0xc   : > { %p131_p6 = scmp.eq.s32.totalorder %s388_s18, 1  ;;  %p38_p7 = scmp.eq.s32.totalorder %s35_s23, 0 }
   0xd   : > { %p651_p8 = por %p54_p5, %p53_p3  ;;  %p137_p10 = scmp.eq.s32.totalorder %s389_s19, 1 }
   0xe   : > { %p655_p9 = por %p131_p6, %p47_p1  ;;  %p416_p13 = scmp.lt.s32.totalorder %s580_s17, 2 }
   0xf   : > { %s660_s26 = scalar_select %p38_p7, %s568_s14, %s40_s21  }
  0x10   : > { %s796_s25 = scalar_select %p655_p9, 1, 0 }
  0x11   : > { %p662_p11 = por %p137_p10, %p53_p3  ;;  %s169_s28 = sand.u32 1, %s568_s14  }
  0x12   : > { %s394_s29 = sshll.u32 %s169_s28, 2  ;;  %s395_s30 = sshll.u32 %s576_s16, 6 }
  0x13   : > { %s797_s27 = scalar_select %p662_p11, 1, 0 }
  0x14   : > { %s673_s6 = scalar_lea.hbm %s789_s0, %s395_s30  ;;  %s173_s7 = scalar_lea.vmem [#allocation2], %s394_s29 }
  0x15   : > { %s181_s8 = sshll.u32 %s173_s7, 4  ;;  %p679_p0 = pnand %p416_p13, %p645_p4  ;;  %s675_s8 = int_to_ptr.vmem [resolvable:$true] %s181_s8 }
  0x16   : > { %s170_s10 = scalar_lea.sflag [#allocation3], %s169_s28  ;;  %s468_s11 = scalar_lea.hbm %s673_s6, 64 }
  0x17   : > { %p469_p3 = scmp.ne.s32.totalorder %s673_s6, %s468_s11  ;;  %p470_p5 = pneg %p679_p0 }
  0x18   : > { %s473_s21 = scalar_lea.hbm %s789_s0, 128  ;;  %p474_p4 = scmp.lt.u32.totalorder %s673_s6, %s789_s0 }
  0x19   : > { %p471_p6 = pnand %p470_p5, %p469_p3  ;;  %p475_p10 = scmp.lt.u32.totalorder %s473_s21, %s468_s11 }
  0x1a   : > { %p477_p12 = scmp.lt.u32.totalorder %s468_s11, %s673_s6 }
  0x1b   : > { %p472_p7 = pneg %p471_p6  ;;  %p476_p13 = por %p475_p10, %p474_p4 }
  0x1d   : > { %p478_p1 = por %p477_p12, %p476_p13 }
  0x1f   : > { %p479_p2 = pnand %p478_p1, %p472_p7 }
  0x21   : > { %482 = shalt.err (!%p479_p2)
}
  0x22   : > { %s483_s28 = scalar_lea.vmem %s675_s8, 64  ;;  %s582_s29 = smov [#allocation2]  }
  0x23   : > { %p484_p3 = scmp.ne.s32.totalorder %s675_s8, %s483_s28  ;;  %s488_s30 = sshll.u32 %s582_s29, 4  ;;  %s489_s30 = int_to_ptr.vmem [resolvable:$false] %s488_s30 }
  0x24   : > { %s490_s4 = scalar_lea.vmem %s489_s30, 128  ;;  %p491_p9 = scmp.lt.s32.totalorder %s675_s8, %s489_s30 }
  0x25   : > { %p486_p6 = pnand %p484_p3, %p470_p5  ;;  %p492_p4 = scmp.lt.s32.totalorder %s490_s4, %s483_s28 }
  0x27   : > { %p487_p11 = pneg %p486_p6  ;;  %p493_p10 = por %p492_p4, %p491_p9 }
  0x29   : > { %p494_p12 = pnand %p493_p10, %p487_p11 }
  0x2b   : > { %497 = shalt.err (!%p494_p12)
}
  0x2c   : > { %411 = dma.hbm_to_vmem [thread:$0]  (!%p679_p0), %s673_s6, 64, %s675_s8, %s170_s10  }
  0x2d   : > { %p799_p1 = scmp.lt.s32.totalorder %s580_s17, 3  ;;  %p800_p2 = scmp.ge.s32.totalorder %s580_s17, 1 }
  0x2f   : > { %p187_p5 = pnand %p800_p2, %p799_p1 }
  0x30   : > { %s715_s5 = sand.u32 (!%p187_p5), 1, %s564_s13  }
  0x31   : > { %190 = sbr.rel (%p187_p5) target bundleno = 127 (0x7f), region = 32  ;;  %s397_s7 = sshll.u32 (!%p187_p5), %s715_s5, 2 }
  0x32   : > { %s193_s11 = scalar_lea.sflag (!%p187_p5), [#allocation3], %s715_s5  ;;  %s196_s9 = scalar_lea.vmem (!%p187_p5), [#allocation2], %s397_s7 }
  0x38   : > { %551 = dma.done.wait (%p651_p8), %s193_s11, 64  }
  0x39   : > { %553 = vsyncadd (%p651_p8), %s193_s11, 4294967232  ;;  %vm232_vm0 = vcmask 257024   ;;  %v231_v0 = vld [vmem:[%s196_s9] sm:$0xf]  ;;  %v256_v20 = vlaneseq  ;;  %s224_s18 = scalar_lea.vmem [#allocation5], %s397_s7  ;;  %s401_s21 = sshll.u32 %s572_s15, 6 }
  0x3a   : > { %v233_v1 = vsel %vm232_vm0, %v231_v0, 0.0  ;;  %v253_v22 = vld [vmem:[%s790_s1] sm:$0x1]  ;;  %s284_s19 = sshll.u32 %s224_s18, 4  ;;  %s741_s28 = scalar_lea.hbm %s792_s3, %s401_s21  ;;  %s736_s19 = int_to_ptr.vmem [resolvable:$true] %s284_s19 }
  0x3b   : > { %v234_v2 = vrot.slane %v233_v1, 4  ;;  %v257_v21 = vshrl.u32 %v256_v20, 7  ;;  %v399_v27 = vld [vmem:[%s791_s2] ss:$0 sm:$0xff]  ;;  %s270_s29 = scalar_lea.sflag [#allocation4], %s715_s5  ;;  %s498_s30 = scalar_lea.vmem %s736_s19, 64 }
  0x3c   : > { %p499_p8 = scmp.ne.s32.totalorder %s736_s19, %s498_s30  ;;  %p801_p9 = scmp.ne.s32.totalorder %s796_s25, 0 }
  0x3d   : > { %v235_v3 = vadd.f32 %v234_v2, %v233_v1  ;;  %v258_v23 = vsub.s32 0, %v257_v21  ;;  %s583_s15 = smov [#allocation5]  }
  0x3e   : > { %p500_p11 = pnand %p499_p8, %p801_p9  ;;  %s502_s4 = sshll.u32 %s583_s15, 4  ;;  %s503_s4 = int_to_ptr.vmem [resolvable:$false] %s502_s4 }
  0x3f   : > { %v236_v4 = vrot.slane %v235_v3, 2  ;;  %s504_s7 = scalar_lea.vmem %s503_s4, 128  ;;  %p505_p7 = scmp.lt.s32.totalorder %s736_s19, %s503_s4 }
  0x40   : > { %p501_p0 = pneg %p500_p11  ;;  %p506_p13 = scmp.lt.s32.totalorder %s504_s7, %s498_s30 }
  0x41   : > { %v237_v5 = vadd.f32 %v236_v4, %v235_v3 }
  0x42   : > { %p507_p3 = por %p506_p13, %p505_p7 }
  0x43   : > { %v238_v6 = vrot.slane %v237_v5, 1 }
  0x44   : > { %p508_p6 = pnand %p507_p3, %p501_p0 }
  0x45   : > { %v239_v7 = vadd.f32 %v238_v6, %v237_v5 }
  0x47   : > { %v240_v8 = vmul.f32 0.25, %v239_v7 }
  0x49   : > { %v241_v9 = vsub.f32 %v231_v0, %v240_v8 }
  0x4b   : > { %v242_v10 = vmul.f32 %v241_v9, %v241_v9 }
  0x4d   : > { %v243_v11 = vsel %vm232_vm0, %v242_v10, 0.0 }
  0x4e   : > { %v244_v12 = vrot.slane %v243_v11, 4 }
  0x50   : > { %v245_v13 = vadd.f32 %v244_v12, %v243_v11 }
  0x52   : > { %v246_v14 = vrot.slane %v245_v13, 2 }
  0x54   : > { %v247_v15 = vadd.f32 %v246_v14, %v245_v13 }
  0x56   : > { %v248_v16 = vrot.slane %v247_v15, 1 }
  0x58   : > { %v249_v17 = vadd.f32 %v248_v16, %v247_v15 }
  0x5a   : > { %v250_v18 = vmul.f32 0.25, %v249_v17 }
  0x5c   : > { %v251_v19 = vadd.f32 1e-05, %v250_v18 }
  0x5e   : > { %466 = vrsqrt.f32 %v251_v19 }
  0x68   : > { %v467_v24 = vpop.eup %466 }
  0x69   : > { %v255_v25 = vmul.f32 %v467_v24, %v253_v22 }
  0x6b   : > { %v259_v26 = vrot.slane %v255_v25, %v258_v23 }
  0x6d   : > { %v260_v28 = vmul.f32 %v259_v26, %v241_v9 }
  0x6f   : > { %v267_v29 = vadd.f32 %v399_v27, %v260_v28 }
  0x71   : > { %268 = vst.msk [vmem:[%s224_s18] sm:$0xf] %vm232_vm0, %v267_v29 }
  0x72   : > { %511 = shalt.err (!%p508_p6)
}
  0x73   : > { %s512_s5 = scalar_lea.hbm %s741_s28, 64  ;;  %s516_s24 = scalar_lea.hbm %s792_s3, 128 }
  0x74   : > { %p513_p4 = scmp.ne.s32.totalorder %s741_s28, %s512_s5  ;;  %p517_p1 = scmp.lt.u32.totalorder %s741_s28, %s792_s3 }
  0x75   : > { %p518_p2 = scmp.lt.u32.totalorder %s516_s24, %s512_s5  ;;  %p520_p8 = scmp.lt.u32.totalorder %s512_s5, %s741_s28 }
  0x76   : > { %p514_p10 = pnand %p513_p4, %p801_p9 }
  0x77   : > { %p519_p5 = por %p518_p2, %p517_p1 }
  0x78   : > { %p515_p12 = pneg %p514_p10 }
  0x79   : > { %p521_p11 = por %p520_p8, %p519_p5 }
  0x7b   : > { %p522_p0 = pnand %p521_p11, %p515_p12 }
  0x7d   : > { %525 = shalt.err (!%p522_p0)
}
  0x7e   : > { %406 = dma.vmem_to_hbm [thread:$0]  (%p801_p9), %s736_s19, 64, %s741_s28, %s270_s29  }
  0x7f PF: > { %s296_s10 = sand.u32 1, %s560_s12   ;;  %p802_p7 = scmp.ne.s32.totalorder %s797_s27, 0 }
  0x80   : > { %p803_p13 = scmp.ge.s32.totalorder %s580_s17, 2  ;;  %s297_s18 = scalar_lea.sflag [#allocation4], %s296_s10 }
  0x82   : > { %p413_p3 = pnand %p803_p13, %p802_p7 }
  0x84   : > { %555 = dma.done.wait (!%p413_p3), %s297_s18, 64  }
  0x85   : > { %557 = vsyncadd (!%p413_p3), %s297_s18, 4294967232  ;;  %s19_s17 = sadd.s32 1, %s580_s17   ;;  %s804_s12 = smov %s564_s13 }
  0x86   : > { %p16_p6 = scmp.ge.s32.totalorder %s19_s17, 4   ;;  %s805_s13 = smov %s568_s14 }
  0x87   : > { %s806_s14 = smov %s660_s26  ;;  %s807_s15 = smov %s576_s16 }
  0x88   : > { %s808_s16 = smov %s810_s20  ;;  %18 = sbr.rel (!%p16_p6) target bundleno = 6 (0x6), region = 83 }
  0x8f   :  { %302 = vsyncpa [#allocation3], 1 }
  0x90   :  { %304 = vsyncpa [#allocation3 + $0x1], 1 }
  0x91   :  { %305 = vsyncpa [#allocation4], 1 }
  0x92   :  { %307 = vsyncpa [#allocation4 + $0x1], 1 }

</bundles_post_ra>
